<compile_context>
chip_gen: v5e
topology: v5e:2x2
jax: 0.10.0
libtpu: 0.0.40
codegen_flags: <defaults>
</compile_context>

<pallas_src>
from functools import partial
import math

import jax
import jax.numpy as jnp
from jax.experimental import pallas as pl
from jax.experimental.pallas import tpu as pltpu


def _conv_bn_lrelu_kernel(xa_ref, xb_ref, w_ref, sb_ref, o_ref, win_ref, rhs_ref,
                          *, R, Wpp, Cin, slope):
    """One (image, row-tile) grid step.

    xa_ref : [1, Cin, M]      padded rows [t*R, t*R+R) of this image, flattened, bf16
    xb_ref : [1, Cin, M]      padded rows [t*R+R, t*R+2R) (halo source), bf16
    w_ref  : [Cout, 9*Cin]    conv taps packed along the contraction axis, bf16
    sb_ref : [Cout, 2]        folded BN scale (col 0) / bias (col 1), f32
    o_ref  : [1, Cout, M]     output tile, M = R*Wpp lanes (padded cols cropped by wrapper)
    win_ref: [Cin, (R+3)*Wpp] f32 VMEM scratch: halo window
    rhs_ref: [9*Cin, M]       f32 VMEM scratch: packed im2col RHS for one K=9*Cin matmul
    """
    M = R * Wpp

    # --- Assemble the halo window: R rows from this tile + 3 rows from the next block.
    #     (Only 2 halo rows are mathematically needed; the 3rd keeps the dy=2 tap slices
    #      in-bounds for the garbage columns at the tail of the last row.)
    win_ref[:, pl.ds(0, M)] = xa_ref[0].astype(jnp.float32)
    win_ref[:, pl.ds(M, 3 * Wpp)] = xb_ref[0, :, pl.ds(0, 3 * Wpp)].astype(jnp.float32)

    # --- im2col pack: 9 statically-shifted copies -> one dense K = 9*Cin contraction.
    for dy in range(3):
        for dx in range(3):
            tap = dy * 3 + dx
            off = dy * Wpp + dx                                   # static lane offset
            rhs_ref[pl.ds(tap * Cin, Cin), :] = win_ref[:, pl.ds(off, M)]

    # --- Single MXU matmul, bf16 operands, f32 accumulation.
    y = jnp.dot(w_ref[...], rhs_ref[...].astype(jnp.bfloat16),
                preferred_element_type=jnp.float32)               # [Cout, M]

    # --- Fused inference-BN + LeakyReLU epilogue (f32).
    y = y * sb_ref[:, 0:1] + sb_ref[:, 1:2]
    y = jnp.maximum(y, y * slope)
    o_ref[0] = y.astype(o_ref.dtype)


def conv_bn_relu_forward(x, weight, bn_scale, bn_bias, *, negative_slope=0.01,
                         rows_per_tile=8):
    """x: [N, Cin, H, W] (NCHW); weight: [Cout, Cin, 3, 3] (OIHW);
    bn_scale/bn_bias: [Cout] folded BN affine.  Returns [N, Cout, H, W] f32."""
    N, Cin, H, W = x.shape
    Cout = weight.shape[0]
    assert weight.shape == (Cout, Cin, 3, 3), "only kernel_size=3 is implemented"

    R = max(4, int(rows_per_tile))          # need >= 3 halo rows available in the next block
    n_tiles = pl.cdiv(H, R)
    H_eff = n_tiles * R                     # row extent actually computed (extra rows cropped)
    Hp = (n_tiles + 1) * R                  # padded rows; row p holds original row p-1

    # Padded row pitch: >= W+2 (conv halo) and such that M = R*Wpp is a multiple of 128
    # -> every activation/output lane block is 128-dense (unmasked loads/stores).
    lane_q = 128 // math.gcd(R, 128)
    Wpp = ((W + 2 + lane_q - 1) // lane_q) * lane_q
    M = R * Wpp

    # Zero-pad (1 top, slack bottom, 1 left, slack right), cast to bf16, flatten rows -> lanes.
    x_pad = jnp.pad(x, ((0, 0), (0, 0), (1, Hp - H - 1), (1, Wpp - W - 1)))
    x_flat = x_pad.astype(jnp.bfloat16).reshape(N, Cin, Hp * Wpp)

    # OIHW -> [Cout, 9*Cin], tap-major contraction axis matching the in-kernel im2col order.
    w_packed = jnp.transpose(weight, (0, 2, 3, 1)).reshape(Cout, 9 * Cin).astype(jnp.bfloat16)
    sb = jnp.stack([bn_scale, bn_bias], axis=-1).astype(jnp.float32)          # [Cout, 2]

    kernel = partial(_conv_bn_lrelu_kernel, R=R, Wpp=Wpp, Cin=Cin,
                     slope=float(negative_slope))
    y = pl.pallas_call(
        kernel,
        out_shape=jax.ShapeDtypeStruct((N, Cout, H_eff * Wpp), jnp.float32),
        grid=(N, n_tiles),
        in_specs=[
            pl.BlockSpec((1, Cin, M), lambda n, t: (n, 0, t)),        # this row tile
            pl.BlockSpec((1, Cin, M), lambda n, t: (n, 0, t + 1)),    # next tile (halo rows)
            pl.BlockSpec((Cout, 9 * Cin), lambda n, t: (0, 0)),       # resident packed taps
            pl.BlockSpec((Cout, 2), lambda n, t: (0, 0)),             # resident BN scale/bias
        ],
        out_specs=pl.BlockSpec((1, Cout, M), lambda n, t: (n, 0, t)),
        scratch_shapes=[
            pltpu.VMEM((Cin, (R + 3) * Wpp), jnp.float32),            # halo window
            pltpu.VMEM((9 * Cin, M), jnp.float32),                    # packed im2col RHS
        ],
        compiler_params=pltpu.CompilerParams(
            dimension_semantics=("parallel", "parallel")),            # batch x row tiles
    )(x_flat, x_flat, w_packed, sb)

    # Crop padded rows / columns -> NCHW.  TODO(synk): fuse this crop into the consumer.
    return y.reshape(N, Cout, H_eff, Wpp)[:, :, :H, :W]


def _reference_forward(x, weight, bn_scale, bn_bias, negative_slope=0.01):
    """Pure-JAX reference: Conv2d(3,1,1,bias=False) + folded BN + LeakyReLU(0.01)."""
    y = jax.lax.conv_general_dilated(
        x.astype(jnp.float32), weight.astype(jnp.float32),
        window_strides=(1, 1), padding=((1, 1), (1, 1)),
        dimension_numbers=("NCHW", "OIHW", "NCHW"),
        precision=jax.lax.Precision.HIGHEST)
    y = y * bn_scale[None, :, None, None] + bn_bias[None, :, None, None]
    return jnp.where(y >= 0, y, negative_slope * y)


if __name__ == "__main__":
    key = jax.random.PRNGKey(0)
    k_x, k_w, k_g, k_b, k_m, k_v = jax.random.split(key, 6)

    N, Cin, Cout, H, W = 2, 8, 16, 16, 16
    x = jax.random.normal(k_x, (N, Cin, H, W), dtype=jnp.float32)
    weight = jax.random.normal(k_w, (Cout, Cin, 3, 3), dtype=jnp.float32) * 0.1

    # Deterministic InPlaceABN (inference) parameters: gamma/beta + running stats.
    gamma = jax.random.uniform(k_g, (Cout,), dtype=jnp.float32, minval=0.5, maxval=1.5)
    beta = jax.random.normal(k_b, (Cout,), dtype=jnp.float32) * 0.1
    running_mean = jax.random.normal(k_m, (Cout,), dtype=jnp.float32) * 0.1
    running_var = jax.random.uniform(k_v, (Cout,), dtype=jnp.float32, minval=0.5, maxval=1.5)
    eps = 1e-5
    bn_scale = gamma / jnp.sqrt(running_var + eps)
    bn_bias = beta - running_mean * bn_scale

    out = conv_bn_relu_forward(x, weight, bn_scale, bn_bias, rows_per_tile=8)
    out = jax.block_until_ready(out)
    assert out.shape == (N, Cout, H, W), out.shape

    # 1) Exact-math check: same bf16 operand quantization as the kernel, f32 accumulation.
    ref_q = _reference_forward(x.astype(jnp.bfloat16).astype(jnp.float32),
                               weight.astype(jnp.bfloat16).astype(jnp.float32),
                               bn_scale, bn_bias)
    assert jnp.allclose(out, ref_q, atol=1e-4, rtol=1e-4), float(jnp.abs(out - ref_q).max())

    # 2) Module-semantics check (full f32 conv) at a tolerance appropriate for bf16 operands.
    ref = _reference_forward(x, weight, bn_scale, bn_bias)
    assert jnp.allclose(out, ref, atol=3e-2, rtol=3e-2), float(jnp.abs(out - ref).max())

    print("KERNEL_OK")
</pallas_src>

<mosaic_0001>
module attributes {stable_mosaic.version = 11 : i64} {
  func.func @_conv_bn_lrelu_kernel(%arg0: i32, %arg1: i32, %arg2: memref<1x8x256xbf16, #tpu.memory_space<vmem>>, %arg3: memref<1x8x256xbf16, #tpu.memory_space<vmem>>, %arg4: memref<16x72xbf16, #tpu.memory_space<vmem>>, %arg5: memref<16x2xf32, #tpu.memory_space<vmem>>, %arg6: memref<1x16x256xf32, #tpu.memory_space<vmem>>, %arg7: memref<8x352xf32, #tpu.memory_space<vmem>>, %arg8: memref<72x256xf32, #tpu.memory_space<vmem>>) attributes {dimension_semantics = [#tpu.dimension_semantics<parallel>, #tpu.dimension_semantics<parallel>], iteration_bounds = array<i64: 2, 2>, scalar_prefetch = 0 : i64, scratch_operands = 2 : i64, tpu.core_type = #tpu.core_type<tc>, window_params = [{transform_indices = @transform_0, window_bounds = array<i64: 1, 8, 256>}, {transform_indices = @transform_1, window_bounds = array<i64: 1, 8, 256>}, {pipeline_mode = #tpu.pipeline_mode<synchronous>, transform_indices = @transform_2, window_bounds = array<i64: 16, 72>}, {pipeline_mode = #tpu.pipeline_mode<synchronous>, transform_indices = @transform_3, window_bounds = array<i64: 16, 2>}, {transform_indices = @transform_4, window_bounds = array<i64: 1, 16, 256>}]} {
    %c0 = arith.constant 0 : index
    %c0_0 = arith.constant 0 : index
    %c0_1 = arith.constant 0 : index
    %0 = vector.load %arg2[%c0, %c0_0, %c0_1] : memref<1x8x256xbf16, #tpu.memory_space<vmem>>, vector<1x8x256xbf16>
    %1 = vector.shape_cast %0 : vector<1x8x256xbf16> to vector<8x256xbf16>
    %2 = arith.extf %1 : vector<8x256xbf16> to vector<8x256xf32>
    %c0_2 = arith.constant 0 : index
    %c0_3 = arith.constant 0 : index
    %3 = vector.load %arg7[%c0_2, %c0_3] : memref<8x352xf32, #tpu.memory_space<vmem>>, vector<8x256xf32>
    tpu.vector_store %arg7[%c0_2, %c0_3], %2 {strides = array<i32>} : memref<8x352xf32, #tpu.memory_space<vmem>>, vector<8x256xf32>,
    %c0_4 = arith.constant 0 : index
    %c0_5 = arith.constant 0 : index
    %c0_6 = arith.constant 0 : index
    %4 = vector.load %arg3[%c0_4, %c0_5, %c0_6] : memref<1x8x256xbf16, #tpu.memory_space<vmem>>, vector<1x8x96xbf16>
    %5 = vector.shape_cast %4 : vector<1x8x96xbf16> to vector<8x96xbf16>
    %6 = arith.extf %5 : vector<8x96xbf16> to vector<8x96xf32>
    %c0_7 = arith.constant 0 : index
    %c256 = arith.constant 256 : index
    %7 = vector.load %arg7[%c0_7, %c256] : memref<8x352xf32, #tpu.memory_space<vmem>>, vector<8x96xf32>
    tpu.vector_store %arg7[%c0_7, %c256], %6 {strides = array<i32>} : memref<8x352xf32, #tpu.memory_space<vmem>>, vector<8x96xf32>,
    %c0_8 = arith.constant 0 : index
    %c0_9 = arith.constant 0 : index
    %8 = vector.load %arg7[%c0_8, %c0_9] : memref<8x352xf32, #tpu.memory_space<vmem>>, vector<8x256xf32>
    %c0_10 = arith.constant 0 : index
    %c0_11 = arith.constant 0 : index
    %9 = vector.load %arg8[%c0_10, %c0_11] : memref<72x256xf32, #tpu.memory_space<vmem>>, vector<8x256xf32>
    tpu.vector_store %arg8[%c0_10, %c0_11], %8 {strides = array<i32>} : memref<72x256xf32, #tpu.memory_space<vmem>>, vector<8x256xf32>,
    %c0_12 = arith.constant 0 : index
    %c1 = arith.constant 1 : index
    %10 = vector.load %arg7[%c0_12, %c1] : memref<8x352xf32, #tpu.memory_space<vmem>>, vector<8x256xf32>
    %c8 = arith.constant 8 : index
    %c0_13 = arith.constant 0 : index
    %11 = vector.load %arg8[%c8, %c0_13] : memref<72x256xf32, #tpu.memory_space<vmem>>, vector<8x256xf32>
    tpu.vector_store %arg8[%c8, %c0_13], %10 {strides = array<i32>} : memref<72x256xf32, #tpu.memory_space<vmem>>, vector<8x256xf32>,
    %c0_14 = arith.constant 0 : index
    %c2 = arith.constant 2 : index
    %12 = vector.load %arg7[%c0_14, %c2] : memref<8x352xf32, #tpu.memory_space<vmem>>, vector<8x256xf32>
    %c16 = arith.constant 16 : index
    %c0_15 = arith.constant 0 : index
    %13 = vector.load %arg8[%c16, %c0_15] : memref<72x256xf32, #tpu.memory_space<vmem>>, vector<8x256xf32>
    tpu.vector_store %arg8[%c16, %c0_15], %12 {strides = array<i32>} : memref<72x256xf32, #tpu.memory_space<vmem>>, vector<8x256xf32>,
    %c0_16 = arith.constant 0 : index
    %c32 = arith.constant 32 : index
    %14 = vector.load %arg7[%c0_16, %c32] : memref<8x352xf32, #tpu.memory_space<vmem>>, vector<8x256xf32>
    %c24 = arith.constant 24 : index
    %c0_17 = arith.constant 0 : index
    %15 = vector.load %arg8[%c24, %c0_17] : memref<72x256xf32, #tpu.memory_space<vmem>>, vector<8x256xf32>
    tpu.vector_store %arg8[%c24, %c0_17], %14 {strides = array<i32>} : memref<72x256xf32, #tpu.memory_space<vmem>>, vector<8x256xf32>,
    %c0_18 = arith.constant 0 : index
    %c33 = arith.constant 33 : index
    %16 = vector.load %arg7[%c0_18, %c33] : memref<8x352xf32, #tpu.memory_space<vmem>>, vector<8x256xf32>
    %c32_19 = arith.constant 32 : index
    %c0_20 = arith.constant 0 : index
    %17 = vector.load %arg8[%c32_19, %c0_20] : memref<72x256xf32, #tpu.memory_space<vmem>>, vector<8x256xf32>
    tpu.vector_store %arg8[%c32_19, %c0_20], %16 {strides = array<i32>} : memref<72x256xf32, #tpu.memory_space<vmem>>, vector<8x256xf32>,
    %c0_21 = arith.constant 0 : index
    %c34 = arith.constant 34 : index
    %18 = vector.load %arg7[%c0_21, %c34] : memref<8x352xf32, #tpu.memory_space<vmem>>, vector<8x256xf32>
    %c40 = arith.constant 40 : index
    %c0_22 = arith.constant 0 : index
    %19 = vector.load %arg8[%c40, %c0_22] : memref<72x256xf32, #tpu.memory_space<vmem>>, vector<8x256xf32>
    tpu.vector_store %arg8[%c40, %c0_22], %18 {strides = array<i32>} : memref<72x256xf32, #tpu.memory_space<vmem>>, vector<8x256xf32>,
    %c0_23 = arith.constant 0 : index
    %c64 = arith.constant 64 : index
    %20 = vector.load %arg7[%c0_23, %c64] : memref<8x352xf32, #tpu.memory_space<vmem>>, vector<8x256xf32>
    %c48 = arith.constant 48 : index
    %c0_24 = arith.constant 0 : index
    %21 = vector.load %arg8[%c48, %c0_24] : memref<72x256xf32, #tpu.memory_space<vmem>>, vector<8x256xf32>
    tpu.vector_store %arg8[%c48, %c0_24], %20 {strides = array<i32>} : memref<72x256xf32, #tpu.memory_space<vmem>>, vector<8x256xf32>,
    %c0_25 = arith.constant 0 : index
    %c65 = arith.constant 65 : index
    %22 = vector.load %arg7[%c0_25, %c65] : memref<8x352xf32, #tpu.memory_space<vmem>>, vector<8x256xf32>
    %c56 = arith.constant 56 : index
    %c0_26 = arith.constant 0 : index
    %23 = vector.load %arg8[%c56, %c0_26] : memref<72x256xf32, #tpu.memory_space<vmem>>, vector<8x256xf32>
    tpu.vector_store %arg8[%c56, %c0_26], %22 {strides = array<i32>} : memref<72x256xf32, #tpu.memory_space<vmem>>, vector<8x256xf32>,
    %c0_27 = arith.constant 0 : index
    %c66 = arith.constant 66 : index
    %24 = vector.load %arg7[%c0_27, %c66] : memref<8x352xf32, #tpu.memory_space<vmem>>, vector<8x256xf32>
    %c64_28 = arith.constant 64 : index
    %c0_29 = arith.constant 0 : index
    %25 = vector.load %arg8[%c64_28, %c0_29] : memref<72x256xf32, #tpu.memory_space<vmem>>, vector<8x256xf32>
    tpu.vector_store %arg8[%c64_28, %c0_29], %24 {strides = array<i32>} : memref<72x256xf32, #tpu.memory_space<vmem>>, vector<8x256xf32>,
    %c0_30 = arith.constant 0 : index
    %c0_31 = arith.constant 0 : index
    %26 = vector.load %arg4[%c0_30, %c0_31] : memref<16x72xbf16, #tpu.memory_space<vmem>>, vector<16x72xbf16>
    %c0_32 = arith.constant 0 : index
    %c0_33 = arith.constant 0 : index
    %27 = vector.load %arg8[%c0_32, %c0_33] : memref<72x256xf32, #tpu.memory_space<vmem>>, vector<72x256xf32>
    %28 = arith.truncf %27 : vector<72x256xf32> to vector<72x256xbf16>
    %cst = arith.constant dense<0.000000e+00> : vector<16x256xf32>
    %29 = tpu.matmul %26, %28, %cst {dimension_numbers = #tpu.dot_dimension_numbers<[1], [0], [0], [1], [0, 0, 1, 1], [], []>} : vector<16x72xbf16>, vector<72x256xbf16>, vector<16x256xf32> -> vector<16x256xf32>
    %c0_34 = arith.constant 0 : index
    %c0_35 = arith.constant 0 : index
    %30 = vector.load %arg5[%c0_34, %c0_35] : memref<16x2xf32, #tpu.memory_space<vmem>>, vector<16x1xf32>
    %31 = vector.broadcast %30 : vector<16x1xf32> to vector<16x256xf32>
    %32 = arith.mulf %29, %31 : vector<16x256xf32>
    %c0_36 = arith.constant 0 : index
    %c1_37 = arith.constant 1 : index
    %33 = vector.load %arg5[%c0_36, %c1_37] : memref<16x2xf32, #tpu.memory_space<vmem>>, vector<16x1xf32>
    %34 = vector.broadcast %33 : vector<16x1xf32> to vector<16x256xf32>
    %35 = arith.addf %32, %34 : vector<16x256xf32>
    %cst_38 = arith.constant 0.00999999977 : f32
    %36 = vector.broadcast %cst_38 : f32 to vector<16x256xf32>
    %37 = arith.mulf %35, %36 : vector<16x256xf32>
    %38 = arith.maximumf %35, %37 : vector<16x256xf32>
    %c0_39 = arith.constant 0 : index
    %c0_40 = arith.constant 0 : index
    %c0_41 = arith.constant 0 : index
    %39 = vector.load %arg6[%c0_39, %c0_40, %c0_41] : memref<1x16x256xf32, #tpu.memory_space<vmem>>, vector<1x16x256xf32>
    %40 = vector.shape_cast %39 : vector<1x16x256xf32> to vector<16x256xf32>
    %41 = vector.shape_cast %38 : vector<16x256xf32> to vector<1x16x256xf32>
    tpu.vector_store %arg6[%c0_39, %c0_40, %c0_41], %41 {strides = array<i32>} : memref<1x16x256xf32, #tpu.memory_space<vmem>>, vector<1x16x256xf32>,
    return
  }
  func.func @transform_0(%arg0: i32, %arg1: i32) -> (i32, i32, i32) {
    %c0_i32 = arith.constant 0 : i32
    %c0_i32_0 = arith.constant 0 : i32
    return %arg0, %c0_i32, %arg1 : i32, i32, i32
  }
  func.func @transform_1(%arg0: i32, %arg1: i32) -> (i32, i32, i32) {
    %c1_i32 = arith.constant 1 : i32
    %0 = arith.addi %arg1, %c1_i32 : i32
    %c0_i32 = arith.constant 0 : i32
    %c0_i32_0 = arith.constant 0 : i32
    return %arg0, %c0_i32, %0 : i32, i32, i32
  }
  func.func @transform_2(%arg0: i32, %arg1: i32) -> (i32, i32) {
    %c0_i32 = arith.constant 0 : i32
    %c0_i32_0 = arith.constant 0 : i32
    %c0_i32_1 = arith.constant 0 : i32
    return %c0_i32, %c0_i32_0 : i32, i32
  }
  func.func @transform_3(%arg0: i32, %arg1: i32) -> (i32, i32) {
    %c0_i32 = arith.constant 0 : i32
    %c0_i32_0 = arith.constant 0 : i32
    %c0_i32_1 = arith.constant 0 : i32
    return %c0_i32, %c0_i32_0 : i32, i32
  }
  func.func @transform_4(%arg0: i32, %arg1: i32) -> (i32, i32, i32) {
    %c0_i32 = arith.constant 0 : i32
    %c0_i32_0 = arith.constant 0 : i32
    return %arg0, %c0_i32, %arg1 : i32, i32, i32
  }
}

</mosaic_0001>

<bundles_post_ra>
// kernel: tpu_custom_call.1
= control target key start
LH: loop header
LB: loop body
LE: loop exit
PB: predicated region body
PF: predicated region fallthrough
CT: control target
= control target key end

     0   :  { %s1382_s0 = inlined_call_operand.hbm [shape: bf16[2,8,768], index: 0, kind: input, shape index: {}]   ;;  %s1383_s1 = inlined_call_operand.hbm [shape: bf16[2,8,768], index: 1, kind: input, shape index: {}]   ;;  %s1384_s2 = inlined_call_operand.vmem [shape: bf16[16,72], index: 2, kind: input, shape index: {}]   ;;  %s1385_s3 = inlined_call_operand.vmem [shape: f32[16,2], index: 3, kind: input, shape index: {}]   ;;  %s1386_s4 = inlined_call_operand.hbm [shape: f32[2,16,512], index: 4, kind: output, shape index: {}]  }
   0x1   :  { %1392 = sst [smem:[#allocation18_spill]] %s1386_s4 }
   0x2   :  { %9 = vsyncpa [#allocation5], 0 }
   0x3   :  { %11 = vsyncpa [#allocation5 + $0x1], 0 }
   0x4   :  { %12 = vsyncpa [#allocation8], 0 }
   0x5   :  { %14 = vsyncpa [#allocation8 + $0x1], 0 }
   0x6   :  { %15 = vsyncpa [#allocation6], 0 }
   0x7   :  { %17 = vsyncpa [#allocation6 + $0x1], 0  ;;  %s1117_s15 = smov 0   ;;  %s1119_s16 = smov 0  }
   0x8   :  { %s1121_s17 = smov 0   ;;  %s1123_s18 = smov 0  }
   0x9   :  { %s1125_s19 = smov 0   ;;  %s1127_s20 = smov 0  }
   0xa   :  { %s1129_s21 = smov 0   ;;  %s1131_s22 = smov 0  }
   0xb   :  { %s1133_s23 = smov 0   ;;  %s1135_s24 = smov 0  }
   0xc   :  { %s1137_s25 = smov 0  }
   0xd LB: > { %1393 = sst [smem:[#allocation13_spill]] %s1069_s23  ;;  %s699_s26 = sadd.s32 4294967295, %s1077_s25   ;;  %s1077_s25 = sphi %s1137_s25, %s23_s25   ;;  %s1073_s24 = sphi %s1135_s24, %s1411_s24   ;;  %s1069_s23 = sphi %s1133_s23, %s1410_s23   ;;  %s1065_s22 = sphi %s1131_s22, %s1409_s22   ;;  %s1061_s21 = sphi %s1129_s21, %s1408_s21   ;;  %s1057_s20 = sphi %s1127_s20, %s1417_s20   ;;  %s1053_s19 = sphi %s1125_s19, %s1416_s19   ;;  %s1049_s18 = sphi %s1123_s18, %s1415_s18   ;;  %s1045_s17 = sphi %s1121_s17, %s1414_s17   ;;  %s1041_s16 = sphi %s1119_s16, %s1413_s16   ;;  %s1037_s15 = sphi %s1117_s15, %s1412_s15  }
   0xe   : > { %1394 = sst [smem:[#allocation14_spill]] %s1073_s24  ;;  %s700_s27 = sadd.s32 4294967294, %s1077_s25  }
   0xf   : > { %s32_s28 = sadd.s32 1, %s1069_s23  ;;  %s35_s29 = sadd.s32 1, %s1073_s24 }
  0x10   : > { %p33_p0 = scmp.ge.s32.totalorder %s32_s28, 2  ;;  %s44_s30 = sadd.s32 1, %s1057_s20 }
  0x11   : > { %p51_p1 = scmp.ne.s32.totalorder %s1057_s20, %s1053_s19  ;;  %p52_p2 = scmp.eq.s32.totalorder %s1077_s25, 0 }
  0x12   : > { %s1180_s5 = scalar_select %p33_p0, 0, %s32_s28  }
  0x13   : > { %s1419_s29 = smov (!%p33_p0, %s35_s29), %s1073_s24  ;;  %p1190_p3 = por %p52_p2, %p51_p1 }
  0x14   : > { %1395 = sst [smem:[#allocation15_spill]] %s1180_s5  ;;  %s40_s6 = ssub.s32 %s1069_s23, %s1180_s5 }
  0x15   : > { %p37_p4 = scmp.ge.s32.totalorder %s1419_s29, 2  ;;  %p57_p5 = scmp.ne.s32.totalorder %s1053_s19, %s1049_s18 }
  0x16   : > { %p1196_p6 = scmp.eq.s32.totalorder %s699_s26, 0  ;;  %s68_s9 = sadd.s32 1, %s1180_s5 }
  0x17   : > { %s1421_s29 = smov (%p37_p4, %s1419_s29), 0  ;;  %s70_s11 = ssub.s32 %s32_s28, %s68_s9 }
  0x18   : > { %1398 = sst [smem:[#allocation16_spill]] %s1421_s29  ;;  %p1208_p7 = por %p1196_p6, %p57_p5 }
  0x19   : > { %s39_s12 = ssub.s32 %s1073_s24, %s1421_s29  ;;  %p155_p8 = scmp.eq.s32.totalorder %s699_s26, 3 }
  0x1a   : > { %s41_s13 = sor.u32 %s40_s6, %s39_s12  ;;  %s71_s14 = sor.u32 %s70_s11, %s39_s12 }
  0x1b   : > { %p42_p9 = scmp.eq.s32.totalorder %s41_s13, 0  ;;  %p1214_p10 = scmp.eq.s32.totalorder %s71_s14, 0 }
  0x1c   : > { %p1221_p11 = por %p155_p8, %p51_p1  ;;  %p161_p12 = scmp.eq.s32.totalorder %s700_s27, 3 }
  0x1d   : > { %s1226_s28 = scalar_select %p42_p9, %s1057_s20, %s44_s30  }
  0x1e   : > { %p1231_p13 = por %p161_p12, %p57_p5  ;;  %p744_p0 = scmp.lt.s32.totalorder %s1077_s25, 4 }
  0x1f   : > { %1402 = sst [smem:[#allocation17_spill]] %s1226_s28  ;;  %s187_s6 = sand.u32 1, %s1057_s20  }
  0x20   : > { %s703_s9 = sshll.u32 %s187_s6, 3  ;;  %s704_s11 = sshll.u32 %s1069_s23, 1 }
  0x21   : > { %s726_s12 = smul.u32 6, %s1073_s24  ;;  %s191_s13 = scalar_lea.vmem [#allocation4], %s703_s9 }
  0x22   : > { %s202_s27 = sshll.u32 %s191_s13, 4  ;;  %p734_p1 = pnand %p744_p0, %p1190_p3  ;;  %s203_s27 = int_to_ptr.vmem [resolvable:$true] %s202_s27 }
  0x23   : > { %s196_s30 = sadd.s32 %s726_s12, %s704_s11  ;;  %p709_p4 = scmp.ge.s32.totalorder %s1077_s25, 1 }
  0x24   : > { %s705_s14 = sshll.u32 %s196_s30, 2  ;;  %p230_p5 = scmp.lt.s32.totalorder %s1077_s25, 5 }
  0x25   : > { %s198_s23 = scalar_lea.hbm %s1382_s0, %s705_s14  ;;  %s188_s7 = scalar_lea.sflag [#allocation5], %s187_s6 }
  0x26   : > { %s200_s9 = sshll.u32 %s198_s23, 4  ;;  %p1248_p8 = pnand %p709_p4, %p230_p5  ;;  %s201_s9 = int_to_ptr.hbm [resolvable:$true] %s200_s9 }
  0x27   : > { %736 = dma.hbm_to_vmem [thread:$0]  (!%p734_p1), %s201_s9, 128, %s203_s27, %s188_s7  }
  0x28   : > { %s74_s28 = sadd.s32 1, %s1045_s17  ;;  %p81_p3 = scmp.ne.s32.totalorder %s1045_s17, %s1041_s16 }
  0x29   : > { %s1256_s11 = scalar_select %p1214_p10, %s1045_s17, %s74_s28  }
  0x2a   : > { %p87_p9 = scmp.ne.s32.totalorder %s1041_s16, %s1037_s15  ;;  %s209_s12 = sand.u32 1, %s1045_s17  }
  0x2b   : > { %s627_s29 = scalar_lea.hbm %s1383_s1, %s705_s14  ;;  %p83_p4 = por %p81_p3, %p52_p2 }
  0x2c   : > { %p1268_p12 = por %p87_p9, %p1196_p6  ;;  %s706_s6 = sshll.u32 %s209_s12, 3 }
  0x2d   : > { %s628_s27 = scalar_lea.hbm %s627_s29, 8  ;;  %s213_s5 = scalar_lea.vmem [#allocation7], %s706_s6 }
  0x2e   : > { %s223_s9 = sshll.u32 %s628_s27, 4  ;;  %s225_s28 = sshll.u32 %s213_s5, 4  ;;  %s224_s9 = int_to_ptr.hbm [resolvable:$true] %s223_s9  ;;  %s226_s28 = int_to_ptr.vmem [resolvable:$true] %s225_s28 }
  0x2f   : > { %p737_p10 = pnand %p744_p0, %p83_p4  ;;  %s210_s15 = scalar_lea.sflag [#allocation8], %s209_s12 }
  0x30   : > { %234 = sbr.rel (%p1248_p8) target bundleno = 371 (0x173), region = 36  ;;  %s1279_s8 = sand.u32 (!%p1248_p8), 1, %s1053_s19  }
  0x31   : > { %739 = dma.hbm_to_vmem [thread:$0]  (!%p737_p10), %s224_s9, 128, %s226_s28, %s210_s15  }
  0x32   : > { %s710_s14 = sshll.u32 (!%p1248_p8), %s1279_s8, 3  ;;  %s237_s7 = scalar_lea.sflag (!%p1248_p8), [#allocation5], %s1279_s8 }
  0x33   : > { %s240_s30 = scalar_lea.vmem (!%p1248_p8), [#allocation4], %s710_s14 }
  0x35   : > { %1024 = dma.done.wait (%p1208_p7), %s237_s7, 128  }
  0x36   : > { %1026 = vsyncadd (%p1208_p7), %s237_s7, 4294967168  ;;  %s246_s12 = sand.u32 1, %s1041_s16  }
  0x37   : > { %s711_s24 = sshll.u32 %s246_s12, 3  ;;  %s247_s13 = scalar_lea.sflag [#allocation8], %s246_s12 }
  0x38   : > { %s250_s29 = scalar_lea.vmem [#allocation7], %s711_s24 }
  0x39   : > { %1028 = dma.done.wait (%p1268_p12), %s247_s13, 128  }
  0x3a   : > { %1030 = vsyncadd (%p1268_p12), %s247_s13, 4294967168  ;;  %v1292_v0 = vld [vmem:[%s240_s30] sm:$0xff]  ;;  %v291_v1 = vld [vmem:[%s250_s29] sm:$0xf]  ;;  %vm293_vm0 = vcmask 785408   ;;  %s1079_s10 = smov 62  }
  0x3b   : > { %v287_v2 = vunpack.c.l.bf16 %v1292_v0  ;;  %v288_v3 = vunpack.c.h.bf16 %v1292_v0  ;;  %v292_v4 = vunpack.c.l.bf16 %v291_v1  ;;  %s1080_s6 = smov 64   ;;  %s1081_s23 = smov 63   ;;  %vm443_vm1 = vcmask 506880   ;;  %v524_v34 = vld [vmem:[%s1385_s3] sm:$0xff]  ;;  %v525_v43 = vld [vmem:[%s1385_s3 + $0x8] sm:$0xff] }
  0x3c   : > { %s1082_s27 = smov 95   ;;  %s1083_s9 = smov 94   ;;  %vm424_vm2 = vcmask 515072   ;;  %vm405_vm3 = vcmask 523264   ;;  %vm489_vm4 = vcmask 1043456   ;;  %vm386_vm5 = vcmask 769024  }
  0x3d   : > { %v847_v5 = vpack.i.bf16 %v288_v3, %v287_v2  ;;  %294 = vst.msk [vmem:[#allocation2 + $0x10] sm:$0xff] %vm293_vm0, %v292_v4  ;;  %s1084_s5 = smov 126   ;;  %s1085_s28 = smov 96   ;;  %vm367_vm6 = vcmask 777216   ;;  %v1087_v37 = vmov 0   ;;  %v1088_v38 = vmov 1  }
  0x3e   : > { %s1086_s15 = smov 127   ;;  %887 = vset.pattern.permute.xlu1 %v1087_v37  ;;  %889 = vset.pattern.permute.xlu0 %v1088_v38  ;;  %vm311_vm7 = vcmask 1039360   ;;  %vm330_vm8 = vcmask 1031168   ;;  %vm485_vm9 = vcmask 588800   ;;  %s720_s29 = sshll.u32 %s1061_s21, 1 }
  0x3f   : > { %848 = vrot.lane.b32.xlu0 %v847_v5, %s1079_s10  ;;  %853 = vrot.lane.b32.xlu1 %v847_v5, %s1080_s6  ;;  %s565_s7 = scalar_lea.sflag [#allocation6], %s1279_s8 }
  0x40   : > { %858 = vrot.lane.b32.xlu2 %v847_v5, %s1081_s23 }
  0x41   : > { %888 = vset.pattern.permute.xlu2 %v1087_v37 }
  0x44   : > { %v433_v6 = vld [vmem:[#allocation2 + $0x10] sm:$0xff] }
  0x47   : > { %441 = vrot.lane.b32.xlu0 %v433_v6, %s1079_s10  ;;  %403 = vrot.lane.b32.xlu1 %v433_v6, %s1080_s6  ;;  %s721_s10 = sshll.u32 %s1065_s22, 3  ;;  %s712_s6 = sshll.u32 %s1279_s8, 5 }
  0x48   : > { %422 = vrot.lane.b32.xlu2 %v433_v6, %s1081_s23  ;;  %s576_s23 = sadd.s32 %s721_s10, %s720_s29 }
  0x4f   : > { %863 = vrot.lane.b32.xlu0 %v847_v5, %s1082_s27  ;;  %365 = vrot.lane.b32.xlu1 %v433_v6, %s1082_s27  ;;  %s722_s27 = sshll.u32 %s576_s23, 3 }
  0x50   : > { %868 = vrot.lane.b32.xlu2 %v847_v5, %s1083_s9 }
  0x57   : > { %384 = vrot.lane.b32.xlu0 %v433_v6, %s1083_s9  ;;  %873 = vrot.lane.b32.xlu1 %v847_v5, %s1084_s5  ;;  %s280_s9 = scalar_lea.vmem [#allocation9], %s712_s6 }
  0x58   : > { %328 = vrot.lane.b32.xlu2 %v433_v6, %s1084_s5  ;;  %s1406_s5 = sld [smem:[#allocation18_spill]] }
  0x5e   : > { %s971_s29 = scalar_lea.hbm %s1406_s5, 128 }
  0x5f   : > { %878 = vrot.lane.b32.xlu0 %v847_v5, %s1085_s28  ;;  %347 = vrot.lane.b32.xlu1 %v433_v6, %s1085_s28  ;;  %s578_s28 = scalar_lea.hbm %s1406_s5, %s722_s27 }
  0x60   : > { %883 = vrot.lane.b32.xlu2 %v847_v5, %s1086_s15  ;;  %s581_s14 = sshll.u32 %s578_s28, 4  ;;  %s582_s14 = int_to_ptr.hbm [resolvable:$true] %s581_s14 }
  0x61   : > { %s965_s30 = sshra.s32 %s582_s14, 4  ;;  %s966_s30 = int_to_ptr.hbm [resolvable:$true] %s965_s30 }
  0x62   : > { %s967_s12 = scalar_lea.hbm %s966_s30, 32  ;;  %p972_p0 = scmp.lt.s32.totalorder %s966_s30, %s1406_s5 }
  0x63   : > { %p968_p2 = scmp.ne.s32.totalorder %s966_s30, %s967_s12  ;;  %p973_p1 = scmp.lt.s32.totalorder %s971_s29, %s967_s12 }
  0x65   : > { %p969_p6 = pnand %p968_p2, %p1221_p11  ;;  %p974_p5 = por %p973_p1, %p972_p0 }
  0x67   : > { %309 = vrot.lane.b32.xlu0 %v433_v6, %s1086_s15  ;;  %528 = vperm.xlu1 %887, %v524_v34   ;;  %s579_s15 = sshll.u32 %s280_s9, 4  ;;  %p970_p7 = pneg %p969_p6  ;;  %s580_s15 = int_to_ptr.vmem [resolvable:$true] %s579_s15 }
  0x68   : > { %533 = vperm.xlu2 %888, %v525_v43  }
  0x69   : > { %p975_p8 = pnand %p974_p5, %p970_p7 }
  0x6f   : > { %541 = vperm.xlu0 %889, %v524_v34   ;;  %890 = vset.pattern.permute.xlu1 %v1088_v38 }
  0x70   : > { %545 = vperm.xlu1 %890, %v525_v43  }
  0x9a   : > { %v859_v7 = vpop.permute.xlu2 %858 }
  0x9b   : > { %v861_v10 = vunpack.i.h.bf16 %v859_v7  ;;  %v860_v11 = vunpack.i.l.bf16 %v859_v7 }
  0x9d   : > { %v425_v20 = vsel %vm424_vm2, %v860_v11, %v861_v10 }
  0xa2   : > { %v423_v8 = vpop.permute.xlu2 %422 }
  0xa3   : > { %v426_v28 = vsel %vm424_vm2, %v861_v10, %v423_v8 }
  0xaa   : > { %v869_v26 = vpop.permute.xlu2 %868 }
  0xab   : > { %v871_v31 = vunpack.i.h.bf16 %v869_v26  ;;  %v870_v32 = vunpack.i.l.bf16 %v869_v26 }
  0xad   : > { %v387_v41 = vsel %vm386_vm5, %v870_v32, %v871_v31 }
  0xb1   : > { %v849_v9 = vpop.permute.xlu0 %848  ;;  %v854_v12 = vpop.permute.xlu1 %853 }
  0xb2   : > { %v851_v13 = vunpack.i.h.bf16 %v849_v9  ;;  %v850_v14 = vunpack.i.l.bf16 %v849_v9  ;;  %v856_v15 = vunpack.i.h.bf16 %v854_v12  ;;  %v855_v16 = vunpack.i.l.bf16 %v854_v12  ;;  %v329_v42 = vpop.permute.xlu2 %328  ;;  %v725_v9 = vld [vmem:[%s1384_s2] sm:$0xff] }
  0xb4   : > { %v444_v17 = vsel %vm443_vm1, %v850_v14, %v851_v13  ;;  %v406_v19 = vsel %vm405_vm3, %v855_v16, %v856_v15 }
  0xb5   : > { %v478_v18 = vpack.c.bf16 %v444_v17, %v444_v17  ;;  %v476_v22 = vpack.c.bf16 %v425_v20, %v406_v19 }
  0xb7   : > { %v491_v21 = vsel %vm489_vm4, %v478_v18, 0 }
  0xb8   : > { %499 = vmatpush.bf16.msra.mxu0 %v491_v21 }
  0xb9   : > { %v442_v23 = vpop.permute.xlu0 %441  ;;  %v404_v24 = vpop.permute.xlu1 %403 }
  0xba   : > { %v445_v25 = vsel %vm443_vm1, %v851_v13, %v442_v23  ;;  %v407_v29 = vsel %vm405_vm3, %v856_v15, %v404_v24  ;;  %v884_v51 = vpop.permute.xlu2 %883 }
  0xbb   : > { %v479_v27 = vpack.c.bf16 %v445_v25, %v445_v25  ;;  %v477_v33 = vpack.c.bf16 %v426_v28, %v407_v29  ;;  %v886_v52 = vunpack.i.h.bf16 %v884_v51  ;;  %v885_v53 = vunpack.i.l.bf16 %v884_v51 }
  0xbc   : > { %500 = vmatpush.bf16.msra.mxu0 %v476_v22 }
  0xbd   : > { %v494_v30 = vsel %vm489_vm4, %v479_v27, 0  ;;  %v312_v60 = vsel %vm311_vm7, %v885_v53, %v886_v52 }
  0xbe   : > { %513 = vmatpush.bf16.msra.mxu1 %v494_v30  ;;  %v470_v6 = vpack.c.bf16 %v312_v60, %v287_v2 }
  0xc1   : > { %v864_v35 = vpop.permute.xlu0 %863  ;;  %v366_v36 = vpop.permute.xlu1 %365 }
  0xc2   : > { %v866_v39 = vunpack.i.h.bf16 %v864_v35  ;;  %v865_v40 = vunpack.i.l.bf16 %v864_v35  ;;  %514 = vmatpush.bf16.msra.mxu1 %v477_v33  ;;  %v534_v19 = vpop.permute.xlu2 %533 }
  0xc4   : > { %v368_v44 = vsel %vm367_vm6, %v865_v40, %v866_v39  ;;  %v369_v48 = vsel %vm367_vm6, %v866_v39, %v366_v36 }
  0xc5   : > { %v474_v45 = vpack.c.bf16 %v387_v41, %v368_v44 }
  0xc7   : > { %501 = vmatpush.bf16.msra.mxu0 %v474_v45 }
  0xc9   : > { %v385_v46 = vpop.permute.xlu0 %384  ;;  %v874_v47 = vpop.permute.xlu1 %873 }
  0xca   : > { %v388_v49 = vsel %vm386_vm5, %v871_v31, %v385_v46  ;;  %v876_v54 = vunpack.i.h.bf16 %v874_v47  ;;  %v875_v55 = vunpack.i.l.bf16 %v874_v47 }
  0xcb   : > { %v475_v50 = vpack.c.bf16 %v388_v49, %v369_v48 }
  0xcc   : > { %v332_v61 = vsel %vm330_vm8, %v876_v54, %v329_v42  ;;  %v331_v63 = vsel %vm330_vm8, %v875_v55, %v876_v54 }
  0xcd   : > { %515 = vmatpush.bf16.msra.mxu1 %v475_v50 }
  0xd1   : > { %v879_v56 = vpop.permute.xlu0 %878  ;;  %v348_v57 = vpop.permute.xlu1 %347 }
  0xd2   : > { %v881_v58 = vunpack.i.h.bf16 %v879_v56  ;;  %v880_v59 = vunpack.i.l.bf16 %v879_v56 }
  0xd4   : > { %v350_v62 = vsel %vm293_vm0, %v881_v58, %v348_v57  ;;  %v349_v1 = vsel %vm293_vm0, %v880_v59, %v881_v58 }
  0xd5   : > { %v472_v4 = vpack.c.bf16 %v349_v1, %v331_v63  ;;  %v473_v5 = vpack.c.bf16 %v350_v62, %v332_v61 }
  0xd7   : > { %502 = vmatpush.bf16.msra.mxu0 %v472_v4  ;;  %516 = vmatpush.bf16.msra.mxu1 %v473_v5 }
  0xd9   : > { %v310_v7 = vpop.permute.xlu0 %309  ;;  %v529_v11 = vpop.permute.xlu1 %528 }
  0xda   : > { %v313_v8 = vsel %vm311_vm7, %v886_v52, %v310_v7 }
  0xdb   : > { %503 = vmatpush.bf16.msra.mxu0 %v470_v6  ;;  %v471_v10 = vpack.c.bf16 %v313_v8, %v288_v3 }
  0xdd   : > { %517 = vmatpush.bf16.msra.mxu1 %v471_v10 }
  0xde   : > { %717 = vmatmul.msk.bf16.vlgmr.msra.gmra.mxu0 %vm485_vm9, %v725_v9 }
  0xe0   : > { %718 = vmatmul.msk.bf16.vlgmr.msra.gmra.mxu1 %vm485_vm9, %v725_v9 }
  0xe1   : > { %v542_v13 = vpop.permute.xlu0 %541 }
  0xe2   : > { %v546_v21 = vpop.permute.xlu1 %545 }
 0x15b   : > { %v505_v12 = vpop.f32.mrf.mxu0 }
 0x15c   : > { %v536_v2 = vmul.f32 %v529_v11, %v505_v12 }
 0x15d   : > { %v519_v14 = vpop.f32.mrf.mxu1 }
 0x15e   : > { %v548_v15 = vadd.f32 %v542_v13, %v536_v2  ;;  %v537_v16 = vmul.f32 %v529_v11, %v519_v14 }
 0x160   : > { %v552_v17 = vmul.f32 0.01, %v548_v15  ;;  %v549_v18 = vadd.f32 %v542_v13, %v537_v16 }
 0x162   : > { %v556_v0 = vmax.f32 %v548_v15, %v552_v17  ;;  %v553_v3 = vmul.f32 0.01, %v549_v18 }
 0x163   : > { %v507_v20 = vpop.f32.mrf.mxu0 }
 0x164   : > { %560 = vst [vmem:[%s280_s9] sm:$0xff] %v556_v0  ;;  %v557_v22 = vmax.f32 %v549_v18, %v553_v3  ;;  %v538_v23 = vmul.f32 %v534_v19, %v507_v20 }
 0x165   : > { %v521_v24 = vpop.f32.mrf.mxu1 }
 0x166   : > { %561 = vst [vmem:[%s280_s9 + $0x8] sm:$0xff] %v557_v22  ;;  %v550_v25 = vadd.f32 %v546_v21, %v538_v23  ;;  %v539_v26 = vmul.f32 %v534_v19, %v521_v24 }
 0x168   : > { %v554_v27 = vmul.f32 0.01, %v550_v25  ;;  %v551_v28 = vadd.f32 %v546_v21, %v539_v26 }
 0x16a   : > { %v558_v29 = vmax.f32 %v550_v25, %v554_v27  ;;  %v555_v30 = vmul.f32 0.01, %v551_v28 }
 0x16c   : > { %562 = vst [vmem:[%s280_s9 + $0x10] sm:$0xff] %v558_v29  ;;  %v559_v31 = vmax.f32 %v551_v28, %v555_v30 }
 0x16e   : > { %563 = vst [vmem:[%s280_s9 + $0x18] sm:$0xff] %v559_v31 }
 0x16f   : > { %978 = shalt.err (!%p975_p8)
}
 0x170   : > { %s1089_s8 = smov 256   ;;  %s1090_s23 = smov 512  }
 0x171   : > { %s1091_s27 = smov 16  }
 0x172   : > { %731 = dma.vmem_to_hbm [thread:$0]  (%p1221_p11), %s580_s15, 512, %s582_s14, %s565_s7, %s1089_s8, %s1090_s23, %s1091_s27  }
 0x173 PF: > { %p745_p3 = scmp.ge.s32.totalorder %s1077_s25, 2  ;;  %s596_s9 = sand.u32 1, %s1049_s18  }
 0x174   : > { %s597_s21 = scalar_lea.sflag [#allocation6], %s596_s9 }
 0x175   : > { %p741_p9 = pnand %p745_p3, %p1231_p13 }
 0x177   : > { %p742_p12 = pneg %p741_p9 }
 0x179   : > { %1032 = dma.done.wait (%p742_p12), %s597_s21, 512  }
 0x17a   : > { %1034 = vsyncadd (%p742_p12), %s597_s21, 4294966784  ;;  %s23_s25 = sadd.s32 1, %s1077_s25   ;;  %s1407_s4 = sld [smem:[#allocation17_spill]] }
 0x17b   : > { %p20_p4 = scmp.ge.s32.totalorder %s23_s25, 6   ;;  %s1408_s21 = sld [smem:[#allocation13_spill]] }
 0x17c   : > { %s1409_s22 = sld [smem:[#allocation14_spill]]  ;;  %s1412_s15 = smov %s1041_s16 }
 0x17d   : > { %s1410_s23 = sld [smem:[#allocation15_spill]]  ;;  %s1413_s16 = smov %s1045_s17 }
 0x17e   : > { %s1411_s24 = sld [smem:[#allocation16_spill]]  ;;  %s1414_s17 = smov %s1256_s11 }
 0x17f   : > { %s1415_s18 = smov %s1053_s19  ;;  %s1416_s19 = smov %s1057_s20 }
 0x180   : > { %s1417_s20 = smov %s1407_s4  ;;  %22 = sbr.rel (!%p20_p4) target bundleno = 13 (0xd), region = 94 }
 0x185   :  { %603 = vsyncpa [#allocation5], 1 }
 0x186   :  { %605 = vsyncpa [#allocation5 + $0x1], 1 }
 0x187   :  { %606 = vsyncpa [#allocation8], 1 }
 0x188   :  { %608 = vsyncpa [#allocation8 + $0x1], 1 }
 0x189   :  { %609 = vsyncpa [#allocation6], 1 }
 0x18a   :  { %611 = vsyncpa [#allocation6 + $0x1], 1 }

</bundles_post_ra>
